<compile_context>
chip_gen: v6e
topology: v6e:2x2x1
jax: 0.10.0
libtpu: 0.0.40
codegen_flags: <defaults>
</compile_context>

<pallas_src>
import jax
import jax.numpy as jnp
from jax import lax
from jax.experimental import pallas as pl
from jax.experimental.pallas import tpu as pltpu

_LANES = 128
_BOXES_PER_ROW = _LANES // 4      # 32 boxes interleaved per 128-lane row
_DIRECT_PATH_MAX_N = 2048         # ragged N processed as (N, 4) in one block


def _box_kernel(size_ref, boxes_ref, out_ref):
    """cxcywh -> clamp(xyxy, 0, 1) * [img_w, img_h, img_w, img_h].

    Works on any tile whose lane width L is a multiple of 4 and holds whole
    boxes as contiguous [cx, cy, w, h] groups: both the packed (rows, 128)
    view (32 boxes / row) and the raw (N, 4) view qualify.
    """
    b = boxes_ref[...].astype(jnp.float32)                 # (bn, L)
    img_h = size_ref[0].astype(jnp.float32)                # SMEM scalars
    img_w = size_ref[1].astype(jnp.float32)

    lanes = b.shape[-1]
    # Lane-pattern constants at (1, L); broadcast against the (bn, L) tile.
    col = lax.broadcasted_iota(jnp.int32, (1, lanes), 1)
    m = col % 4
    is_center = m < 2                                      # lanes holding cx / cy
    sign = jnp.where(is_center, jnp.float32(-0.5), jnp.float32(0.5))
    scale = jnp.where(m % 2 == 0, img_w, img_h)            # [w, h, w, h, ...]

    # Partner coordinate for every lane.  Boxes are 4-aligned within the row,
    # so the wrap-around lanes of the rolls are never selected.
    fwd = jnp.roll(b, -2, axis=1)                          # fwd[j] = b[j + 2]
    bwd = jnp.roll(b, 2, axis=1)                           # bwd[j] = b[j - 2]

    center = jnp.where(is_center, b, bwd)                  # cx or cy at every lane
    extent = jnp.where(is_center, fwd, b)                  # w  or h  at every lane

    xyxy = jnp.clip(center + sign * extent, 0.0, 1.0)      # cxcywh -> xyxy, clamp
    out_ref[...] = xyxy * scale


def _launch(boxes2d, target_size, max_block_rows, donate):
    """Run the kernel over a (rows, L) f32/bf16 view; returns (rows, L) f32."""
    rows, width = boxes2d.shape

    if max_block_rows is None or rows <= max_block_rows:
        block_rows = rows                                  # single whole-array block
        grid = (1,)
        compiler_params = pltpu.CompilerParams(
            dimension_semantics=("arbitrary",))
    else:
        block_rows = max_block_rows                        # multiple of 8 -> legal tile
        grid = (pl.cdiv(rows, block_rows),)
        # Rows are independent: shard the grid across TensorCores (v7x) and
        # give the bigger blocks room (in+out, double-buffered, ~4 MiB each).
        compiler_params = pltpu.CompilerParams(
            dimension_semantics=("parallel",),
            vmem_limit_bytes=32 * 1024 * 1024)

    extra = {}
    if donate and boxes2d.dtype == jnp.float32:
        # Output reuses the (donated) input HBM buffer: inputs are
        # (target_size, boxes2d) -> boxes2d is operand index 1.
        extra["input_output_aliases"] = {1: 0}

    return pl.pallas_call(
        _box_kernel,
        out_shape=jax.ShapeDtypeStruct((rows, width), jnp.float32),
        grid=grid,
        in_specs=[
            pl.BlockSpec(memory_space=pltpu.MemorySpace.SMEM),   # target_size
            pl.BlockSpec((block_rows, width), lambda i: (i, 0)),  # boxes
        ],
        out_specs=pl.BlockSpec((block_rows, width), lambda i: (i, 0)),
        compiler_params=compiler_params,
        **extra,
    )(target_size, boxes2d)


def tracker_post_process(pred_boxes: jax.Array, target_size: jax.Array, *,
                         max_block_rows: int = 4096,
                         donate_boxes: bool = False) -> jax.Array:
    """pred_boxes: (N, 4) cxcywh (normalized); target_size: (2,) = [img_h, img_w].
    Returns (N, 4) float32 xyxy boxes in pixel coordinates."""
    n = pred_boxes.shape[0]
    if n == 0:
        # PyTorch `else` branch: empty track list -> empty (0, 4) boxes tensor.
        return jnp.zeros((0, 4), dtype=jnp.float32)

    # SMEM wants 32-bit scalars; cast only if the caller passed something else
    # (the common f32 / i32 case incurs no wrapper op).
    if target_size.dtype not in (jnp.float32, jnp.int32):
        target_size = target_size.astype(jnp.float32)

    if n % _BOXES_PER_ROW == 0:
        # Lane-dense fast path: contiguous (free) reshape, no pad, no slice.
        packed = pred_boxes.reshape(n // _BOXES_PER_ROW, _LANES)
        out = _launch(packed, target_size, max_block_rows, donate_boxes)
        return out.reshape(n, 4)

    if n <= _DIRECT_PATH_MAX_N:
        # Ragged but realistic N: consume (N, 4) directly in one block.
        # Zero wrapper data movement; the 4-wide lane stores are negligible at
        # this size (the op is launch-bound anyway).
        return _launch(pred_boxes, target_size, None, donate_boxes)

    # Huge ragged N (not realistic for a tracker): pad once to the packed
    # lane-dense layout so the tiled path applies; pad/slice cost amortizes.
    n_pad = pl.cdiv(n, _BOXES_PER_ROW) * _BOXES_PER_ROW
    padded = jnp.pad(pred_boxes, ((0, n_pad - n), (0, 0)))
    out = _launch(padded.reshape(n_pad // _BOXES_PER_ROW, _LANES),
                  target_size, max_block_rows, False)
    return out.reshape(n_pad, 4)[:n]


def _reference(pred_boxes, target_size):
    pred_boxes = pred_boxes.astype(jnp.float32)
    cx, cy, w, h = [pred_boxes[:, i] for i in range(4)]
    xyxy = jnp.stack([cx - 0.5 * w, cy - 0.5 * h,
                      cx + 0.5 * w, cy + 0.5 * h], axis=-1)
    xyxy = jnp.clip(xyxy, 0.0, 1.0)
    img_h, img_w = target_size[0], target_size[1]
    scale = jnp.stack([img_w, img_h, img_w, img_h])
    return xyxy * scale[None, :]


if __name__ == "__main__":
    key = jax.random.PRNGKey(0)
    k1, k2 = jax.random.split(key)
    target_size = jnp.array([480.0, 640.0], jnp.float32)   # (img_h, img_w)

    # Typical track-query count; multiple of 32 -> lane-dense packed path.
    boxes64 = jax.random.uniform(k1, (64, 4), jnp.float32, minval=-0.1, maxval=1.1)
    out64 = jax.block_until_ready(tracker_post_process(boxes64, target_size))
    assert out64.shape == (64, 4)
    assert jnp.allclose(out64, _reference(boxes64, target_size), atol=1e-5, rtol=1e-5)

    # Non-multiple-of-32 count exercises the pad-free direct (N, 4) path.
    boxes37 = jax.random.uniform(k2, (37, 4), jnp.float32, minval=-0.1, maxval=1.1)
    out37 = jax.block_until_ready(tracker_post_process(boxes37, target_size))
    assert out37.shape == (37, 4)
    assert jnp.allclose(out37, _reference(boxes37, target_size), atol=1e-5, rtol=1e-5)

    # Empty-instances branch (mirrors the PyTorch `else`: no kernel launch).
    empty = tracker_post_process(jnp.zeros((0, 4), jnp.float32), target_size)
    assert empty.shape == (0, 4)

    print("KERNEL_OK")
</pallas_src>

<mosaic_0001>
module attributes {stable_mosaic.version = 11 : i64} {
  func.func @_box_kernel(%arg0: i32, %arg1: memref<2xf32, #tpu.memory_space<smem>>, %arg2: memref<2x128xf32, #tpu.memory_space<vmem>>, %arg3: memref<2x128xf32, #tpu.memory_space<vmem>>) attributes {dimension_semantics = [#tpu.dimension_semantics<arbitrary>], iteration_bounds = array<i64: 1>, scalar_prefetch = 0 : i64, scratch_operands = 0 : i64, tpu.core_type = #tpu.core_type<tc>, window_params = [{transform_indices = @transform_0, window_bounds = array<i64: 2>}, {transform_indices = @transform_1, window_bounds = array<i64: 2, 128>}, {transform_indices = @transform_2, window_bounds = array<i64: 2, 128>}]} {
    %c0 = arith.constant 0 : index
    %c0_0 = arith.constant 0 : index
    %0 = vector.load %arg2[%c0, %c0_0] : memref<2x128xf32, #tpu.memory_space<vmem>>, vector<2x128xf32>
    %c0_1 = arith.constant 0 : index
    %1 = memref.load %arg1[%c0_1] : memref<2xf32, #tpu.memory_space<smem>>
    %c1 = arith.constant 1 : index
    %2 = memref.load %arg1[%c1] : memref<2xf32, #tpu.memory_space<smem>>
    %3 = tpu.iota {dimensions = array<i32: 1>} : vector<1x128xi32>
    %c4_i32 = arith.constant 4 : i32
    %c0_i32 = arith.constant 0 : i32
    %4 = arith.cmpi eq, %c4_i32, %c0_i32 : i32
    %c1_i32 = arith.constant 1 : i32
    %5 = arith.select %4, %c1_i32, %c4_i32 : i32
    %6 = vector.broadcast %5 : i32 to vector<1x128xi32>
    %7 = arith.remsi %3, %6 : vector<1x128xi32>
    %c0_i32_2 = arith.constant 0 : i32
    %8 = vector.broadcast %c0_i32_2 : i32 to vector<1x128xi32>
    %9 = arith.cmpi ne, %7, %8 : vector<1x128xi32>
    %c0_i32_3 = arith.constant 0 : i32
    %10 = vector.broadcast %c0_i32_3 : i32 to vector<1x128xi32>
    %11 = arith.cmpi slt, %7, %10 : vector<1x128xi32>
    %c0_i32_4 = arith.constant 0 : i32
    %12 = arith.cmpi slt, %5, %c0_i32_4 : i32
    %13 = vector.broadcast %12 : i1 to vector<1x128xi1>
    %14 = vector.broadcast %13 : vector<1x128xi1> to vector<1x128xi1>
    %15 = arith.xori %11, %14 : vector<1x128xi1>
    %16 = arith.andi %15, %9 : vector<1x128xi1>
    %17 = vector.broadcast %5 : i32 to vector<1x128xi32>
    %18 = arith.addi %7, %17 : vector<1x128xi32>
    %19 = arith.select %16, %18, %7 : vector<1x128xi1>, vector<1x128xi32>
    %c2_i32 = arith.constant 2 : i32
    %20 = vector.broadcast %c2_i32 : i32 to vector<1x128xi32>
    %21 = arith.cmpi slt, %19, %20 : vector<1x128xi32>
    %cst = arith.constant -5.000000e-01 : f32
    %cst_5 = arith.constant 5.000000e-01 : f32
    %22 = vector.broadcast %cst : f32 to vector<1x128xf32>
    %23 = vector.broadcast %cst_5 : f32 to vector<1x128xf32>
    %24 = arith.select %21, %22, %23 : vector<1x128xi1>, vector<1x128xf32>
    %c2_i32_6 = arith.constant 2 : i32
    %c0_i32_7 = arith.constant 0 : i32
    %25 = arith.cmpi eq, %c2_i32_6, %c0_i32_7 : i32
    %c1_i32_8 = arith.constant 1 : i32
    %26 = arith.select %25, %c1_i32_8, %c2_i32_6 : i32
    %27 = vector.broadcast %26 : i32 to vector<1x128xi32>
    %28 = arith.remsi %19, %27 : vector<1x128xi32>
    %c0_i32_9 = arith.constant 0 : i32
    %29 = vector.broadcast %c0_i32_9 : i32 to vector<1x128xi32>
    %30 = arith.cmpi ne, %28, %29 : vector<1x128xi32>
    %c0_i32_10 = arith.constant 0 : i32
    %31 = vector.broadcast %c0_i32_10 : i32 to vector<1x128xi32>
    %32 = arith.cmpi slt, %28, %31 : vector<1x128xi32>
    %c0_i32_11 = arith.constant 0 : i32
    %33 = arith.cmpi slt, %26, %c0_i32_11 : i32
    %34 = vector.broadcast %33 : i1 to vector<1x128xi1>
    %35 = vector.broadcast %34 : vector<1x128xi1> to vector<1x128xi1>
    %36 = arith.xori %32, %35 : vector<1x128xi1>
    %37 = arith.andi %36, %30 : vector<1x128xi1>
    %38 = vector.broadcast %26 : i32 to vector<1x128xi32>
    %39 = arith.addi %28, %38 : vector<1x128xi32>
    %40 = arith.select %37, %39, %28 : vector<1x128xi1>, vector<1x128xi32>
    %c0_i32_12 = arith.constant 0 : i32
    %41 = vector.broadcast %c0_i32_12 : i32 to vector<1x128xi32>
    %42 = arith.cmpi eq, %40, %41 : vector<1x128xi32>
    %43 = vector.broadcast %2 : f32 to vector<1x128xf32>
    %44 = vector.broadcast %1 : f32 to vector<1x128xf32>
    %45 = arith.select %42, %43, %44 : vector<1x128xi1>, vector<1x128xf32>
    %46 = vector.extract_strided_slice %0 {offsets = [0, 2], sizes = [2, 126], strides = [1, 1]} : vector<2x128xf32> to vector<2x126xf32>
    %47 = vector.extract_strided_slice %0 {offsets = [0, 0], sizes = [2, 2], strides = [1, 1]} : vector<2x128xf32> to vector<2x2xf32>
    %48 = tpu.concatenate %46, %47 in 1 : vector<2x126xf32>, vector<2x2xf32> -> vector<2x128xf32>
    %49 = vector.extract_strided_slice %0 {offsets = [0, 126], sizes = [2, 2], strides = [1, 1]} : vector<2x128xf32> to vector<2x2xf32>
    %50 = vector.extract_strided_slice %0 {offsets = [0, 0], sizes = [2, 126], strides = [1, 1]} : vector<2x128xf32> to vector<2x126xf32>
    %51 = tpu.concatenate %49, %50 in 1 : vector<2x2xf32>, vector<2x126xf32> -> vector<2x128xf32>
    %52 = vector.shape_cast %21 : vector<1x128xi1> to vector<1x128xi1>
    %53 = vector.broadcast %52 : vector<1x128xi1> to vector<2x128xi1>
    %54 = arith.select %53, %0, %51 : vector<2x128xi1>, vector<2x128xf32>
    %55 = vector.shape_cast %21 : vector<1x128xi1> to vector<1x128xi1>
    %56 = vector.broadcast %55 : vector<1x128xi1> to vector<2x128xi1>
    %57 = arith.select %56, %48, %0 : vector<2x128xi1>, vector<2x128xf32>
    %58 = vector.broadcast %24 : vector<1x128xf32> to vector<2x128xf32>
    %59 = arith.mulf %58, %57 : vector<2x128xf32>
    %60 = arith.addf %54, %59 : vector<2x128xf32>
    %cst_13 = arith.constant 0.000000e+00 : f32
    %cst_14 = arith.constant 1.000000e+00 : f32
    %61 = vector.broadcast %cst_13 : f32 to vector<2x128xf32>
    %62 = arith.maximumf %61, %60 : vector<2x128xf32>
    %63 = vector.broadcast %cst_14 : f32 to vector<2x128xf32>
    %64 = arith.minimumf %63, %62 : vector<2x128xf32>
    %65 = vector.broadcast %45 : vector<1x128xf32> to vector<2x128xf32>
    %66 = arith.mulf %64, %65 : vector<2x128xf32>
    %c0_15 = arith.constant 0 : index
    %c0_16 = arith.constant 0 : index
    %67 = vector.load %arg3[%c0_15, %c0_16] : memref<2x128xf32, #tpu.memory_space<vmem>>, vector<2x128xf32>
    tpu.vector_store %arg3[%c0_15, %c0_16], %66 {strides = array<i32>} : memref<2x128xf32, #tpu.memory_space<vmem>>, vector<2x128xf32>,
    return
  }
  func.func @transform_0(%arg0: i32) -> i32 {
    %c0_i32 = arith.constant 0 : i32
    %c0_i32_0 = arith.constant 0 : i32
    return %c0_i32 : i32
  }
  func.func @transform_1(%arg0: i32) -> (i32, i32) {
    %c0_i32 = arith.constant 0 : i32
    %c0_i32_0 = arith.constant 0 : i32
    return %arg0, %c0_i32 : i32, i32
  }
  func.func @transform_2(%arg0: i32) -> (i32, i32) {
    %c0_i32 = arith.constant 0 : i32
    %c0_i32_0 = arith.constant 0 : i32
    return %arg0, %c0_i32 : i32, i32
  }
}

</mosaic_0001>

<bundles_post_ra>
// kernel: tpu_custom_call.1
= control target key start
LH: loop header
LB: loop body
LE: loop exit
PB: predicated region body
PF: predicated region fallthrough
CT: control target
= control target key end

     0   :  { %7 = vsyncpa [#allocation5], 0  ;;  %s194_s0 = inlined_call_operand.hbm [shape: f32[2], index: 0, kind: input, shape index: {}]   ;;  %s195_s1 = inlined_call_operand.hbm [shape: f32[2,128], index: 1, kind: input, shape index: {}]   ;;  %s196_s2 = inlined_call_operand.hbm [shape: f32[2,128], index: 2, kind: output, shape index: {}]  }
   0x1   :  { %8 = vsyncpa [#allocation3], 0 }
   0x2   :  { %9 = vsyncpa [#allocation4], 0  ;;  %s164_s9 = smov [#allocation2]   ;;  %s165_s12 = smov [#allocation6]  }
   0x3   :  { %17 = dma.hbm_to_smem %s194_s0, 16, %s164_s9, [#allocation5]  }
   0x4   :  { %s24_s13 = sshll.u32 %s165_s12, 4  ;;  %s25_s13 = int_to_ptr.vmem [resolvable:$true] %s24_s13 }
   0x5   :  { %s126_s14 = scalar_lea.vmem %s25_s13, 32  ;;  %p131_p1 = scmp.lt.s32.totalorder %s25_s13, %s25_s13 }
   0x6   :  { %p127_p0 = scmp.ne.s32.totalorder %s25_s13, %s126_s14  ;;  %p132_p2 = scmp.lt.s32.totalorder %s126_s14, %s126_s14 }
   0x8   :  { %p133_p3 = por %p132_p2, %p131_p1 }
   0xa   :  { %p134_p4 = pnand %p133_p3, %p127_p0 }
   0xc   :  { %137 = shalt.err (!%p134_p4)
}
   0xd   :  { %27 = dma.hbm_to_vmem [thread:$0]  %s195_s1, 32, %s25_s13, [#allocation3]  }
   0xe   :  { %158 = dma.done.wait [#allocation5], 16  }
   0xf   :  { %159 = vsyncadd [#allocation5], 4294967280 }
  0x10   :  { %160 = dma.done.wait [#allocation3], 32  }
  0x11   :  { %161 = vsyncadd [#allocation3], 4294967264 }
  0x12   :  { %34 = sfence }
  0x13   :  { %v35_v0 = vld [vmem:[#allocation6] sm:$0x3]  ;;  %s166_s0 = smov 126   ;;  %s167_s17 = smov 2   ;;  %v38_v1 = vlaneseq  ;;  %v168_v5 = vmov 0.5  }
  0x14   :  { %71 = vrot.lane.b32.xlu0 %v35_v0, %s166_s0  ;;  %s36_s18 = sld [smem:[#allocation2]]  ;;  %s169_s1 = smov [#allocation7]  }
  0x15   :  { %v39_v2 = vand.u32 127, %v38_v1  ;;  %s103_s19 = sld [smem:[#allocation2 + $0x1]]  ;;  %s93_s20 = sshll.u32 %s169_s1, 4  ;;  %s94_s20 = int_to_ptr.vmem [resolvable:$true] %s93_s20 }
  0x16   :  { %s138_s21 = scalar_lea.vmem %s94_s20, 32  ;;  %p143_p6 = scmp.lt.s32.totalorder %s94_s20, %s94_s20 }
  0x17   :  { %v44_v3 = vand.u32 3, %v39_v2  ;;  %p139_p5 = scmp.ne.s32.totalorder %s94_s20, %s138_s21  ;;  %p144_p7 = scmp.lt.s32.totalorder %s138_s21, %s138_s21 }
  0x18   :  { %74 = vrot.lane.b32.xlu0 %v35_v0, %s167_s17 }
  0x19   :  { %vm52_vm0 = vcmp.lt.s32.totalorder %v44_v3, 2  ;;  %v58_v8 = vand.u32 1, %v44_v3  ;;  %p145_p8 = por %p144_p7, %p143_p6 }
  0x1a   :  { %v53_v6 = vsel %vm52_vm0, -0.5, %v168_v5  ;;  %v68_v14 = vstv %s36_s18 }
  0x1b   :  { %vm66_vm1 = vcmp.eq.s32.totalorder %v58_v8, 0  ;;  %v67_v13 = vstv %s103_s19  ;;  %p146_p9 = pnand %p145_p8, %p139_p5 }
  0x1c   :  { %v69_v16 = vsel %vm66_vm1, %v67_v13, %v68_v14 }
  0x86   :  { %v72_v4 = vpop.permute.xlu0 %71 }
  0x87   :  { %v80_v7 = vsel %vm52_vm0, %v72_v4, %v35_v0 }
  0x88   :  { %v81_v9 = vmul.f32 %v80_v7, %v53_v6 }
  0x8a   :  { %v75_v10 = vpop.permute.xlu0 %74 }
  0x8b   :  { %v79_v11 = vsel %vm52_vm0, %v35_v0, %v75_v10 }
  0x8c   :  { %v82_v12 = vadd.f32 %v81_v9, %v79_v11 }
  0x8e   :  { %v83_v15 = vmax.f32 %v82_v12, 0.0 }
  0x90   :  { %v84_v17 = vmin.f32 %v83_v15, 1.0 }
  0x92   :  { %v85_v18 = vmul.f32 %v84_v17, %v69_v16 }
  0x94   :  { %86 = vst [vmem:[#allocation7] sm:$0x3] %v85_v18 }
  0x95   :  { %149 = shalt.err (!%p146_p9)
}
  0x96   :  { %96 = dma.vmem_to_hbm [thread:$0]  %s94_s20, 32, %s196_s2, [#allocation4]  }
  0x97   :  { %162 = dma.done.wait [#allocation4], 32  }
  0x98   :  { %163 = vsyncadd [#allocation4], 4294967264 }
  0x99   :  { %100 = vsyncpa [#allocation3], 1 }
  0x9a   :  { %101 = vsyncpa [#allocation4], 1 }
  0x9b   :  { %102 = vsyncpa [#allocation5], 1 }

</bundles_post_ra>
